<compile_context>
chip_gen: v6e
topology: v6e:2x2x1
jax: 0.10.0
libtpu: 0.0.40
codegen_flags: <defaults>
</compile_context>

<pallas_src>
import jax
import jax.numpy as jnp
from jax import lax
from jax.experimental import pallas as pl
from jax.experimental.pallas import tpu as pltpu


def _one_hot_kernel(x_ref, out_ref):
    # x_ref:   (TM, 1)  int32 token ids (ids on the sublane axis)
    # out_ref: (TM, V)  float32 one-hot output tile (vocab on the lane axis)
    ids = x_ref[...]                                           # (TM, 1)
    tm, v = out_ref.shape
    vocab_iota = lax.broadcasted_iota(jnp.int32, (tm, v), 1)   # (TM, V)
    out_ref[...] = (vocab_iota == ids).astype(out_ref.dtype)


def _round_up(n: int, m: int) -> int:
    return ((n + m - 1) // m) * m


def unary_embedding(x, vocab_size: int, *, row_tile: int = 2048):
    """x: (B, L) integer token ids -> (B, L, vocab_size) float32 one-hot."""
    x = x.astype(jnp.int32)
    B, L = x.shape
    N = B * L

    # Row tile: multiple of 8 (sublane), clamped for tiny inputs.
    n_pad = _round_up(N, 8)
    tm = min(_round_up(row_tile, 8), n_pad)
    grid = pl.cdiv(n_pad, tm)

    # Pad only the (tiny) ids array; -1 never matches the vocab iota.
    x_flat = x.reshape(N, 1)
    if n_pad > N:
        x_flat = jnp.pad(x_flat, ((0, n_pad - N), (0, 0)), constant_values=-1)

    out_bytes = n_pad * vocab_size * 4
    out = pl.pallas_call(
        _one_hot_kernel,
        out_shape=jax.ShapeDtypeStruct((n_pad, vocab_size), jnp.float32),
        grid=(grid,),
        in_specs=[pl.BlockSpec((tm, 1), lambda i: (i, 0))],
        out_specs=pl.BlockSpec((tm, vocab_size), lambda i: (i, 0)),
        compiler_params=pltpu.CompilerParams(
            dimension_semantics=("parallel",),
        ),
        cost_estimate=pl.CostEstimate(
            flops=n_pad * vocab_size,
            transcendentals=0,
            bytes_accessed=out_bytes + n_pad * 4,
        ),
    )(x_flat)

    if n_pad > N:
        out = out[:N]  # rare path (B*L not a multiple of 8); tiny slice
    return out.reshape(B, L, vocab_size)


if __name__ == "__main__":
    # Module defines vocab_size = len(top-300 tokens) = 300.
    VOCAB_SIZE = 300
    B, L = 2, 8

    key = jax.random.PRNGKey(0)
    x = jax.random.randint(key, (B, L), minval=0, maxval=VOCAB_SIZE,
                           dtype=jnp.int32)

    out = unary_embedding(x, VOCAB_SIZE)
    out = jax.block_until_ready(out)

    # Correctness check against plain-JAX reference (torch scatter_ one-hot).
    ref = jax.nn.one_hot(x, VOCAB_SIZE, dtype=jnp.float32)
    assert out.shape == (B, L, VOCAB_SIZE)
    assert out.dtype == jnp.float32
    assert jnp.array_equal(out, ref)

    print("KERNEL_OK")
</pallas_src>

<mosaic_0001>
module attributes {stable_mosaic.version = 11 : i64} {
  func.func @_one_hot_kernel(%arg0: i32, %arg1: memref<16x1xi32, #tpu.memory_space<vmem>>, %arg2: memref<16x300xf32, #tpu.memory_space<vmem>>) attributes {dimension_semantics = [#tpu.dimension_semantics<parallel>], iteration_bounds = array<i64: 1>, scalar_prefetch = 0 : i64, scratch_operands = 0 : i64, tpu.core_type = #tpu.core_type<tc>, window_params = [{transform_indices = @transform_0, window_bounds = array<i64: 16, 1>}, {transform_indices = @transform_1, window_bounds = array<i64: 16, 300>}]} {
    %c0 = arith.constant 0 : index
    %c0_0 = arith.constant 0 : index
    %0 = vector.load %arg1[%c0, %c0_0] : memref<16x1xi32, #tpu.memory_space<vmem>>, vector<16x1xi32>
    %1 = tpu.iota {dimensions = array<i32: 1>} : vector<16x300xi32>
    %2 = vector.broadcast %0 : vector<16x1xi32> to vector<16x300xi32>
    %3 = arith.cmpi eq, %1, %2 : vector<16x300xi32>
    %4 = arith.extui %3 : vector<16x300xi1> to vector<16x300xi32>
    %5 = arith.sitofp %4 : vector<16x300xi32> to vector<16x300xf32>
    %c0_1 = arith.constant 0 : index
    %c0_2 = arith.constant 0 : index
    %6 = vector.load %arg2[%c0_1, %c0_2] : memref<16x300xf32, #tpu.memory_space<vmem>>, vector<16x300xf32>
    tpu.vector_store %arg2[%c0_1, %c0_2], %5 {strides = array<i32>} : memref<16x300xf32, #tpu.memory_space<vmem>>, vector<16x300xf32>,
    return
  }
  func.func @transform_0(%arg0: i32) -> (i32, i32) {
    %c0_i32 = arith.constant 0 : i32
    %c0_i32_0 = arith.constant 0 : i32
    return %arg0, %c0_i32 : i32, i32
  }
  func.func @transform_1(%arg0: i32) -> (i32, i32) {
    %c0_i32 = arith.constant 0 : i32
    %c0_i32_0 = arith.constant 0 : i32
    return %arg0, %c0_i32 : i32, i32
  }
}

</mosaic_0001>

<bundles_post_ra>
// kernel: tpu_custom_call.1
= control target key start
LH: loop header
LB: loop body
LE: loop exit
PB: predicated region body
PF: predicated region fallthrough
CT: control target
= control target key end

     0   :  { %v96_v1 = vmov 0   ;;  %s122_s0 = inlined_call_operand.vmem [shape: s32[16,1], index: 0, kind: input, shape index: {}]   ;;  %s123_s1 = inlined_call_operand.hbm [shape: f32[16,300], index: 1, kind: output, shape index: {}]  }
   0x1   :  { %v9_v0 = vld [vmem:[%s122_s0] sm:$0xff]  ;;  %73 = vset.pattern.permute.xlu0 %v96_v1 }
   0x2   :  { %6 = vsyncpa [#allocation3], 0  ;;  %16 = vperm.xlu0 %73, %v9_v0   ;;  %v10_v2 = vld [vmem:[%s122_s0 + $0x8] sm:$0xff]  ;;  %v11_v3 = vlaneseq  ;;  %vm41_vm0 = vcmask 359424   ;;  %s97_s10 = smov [#allocation2]   ;;  %v98_v8 = vmov 0.0  }
   0x3   :  { %s51_s11 = sshll.u32 %s97_s10, 4  ;;  %s52_s11 = int_to_ptr.vmem [resolvable:$true] %s51_s11 }
   0x4   :  { %v12_v4 = vand.u32 127, %v11_v3  ;;  %s74_s0 = scalar_lea.vmem %s52_s11, 768  ;;  %p79_p1 = scmp.lt.s32.totalorder %s52_s11, %s52_s11 }
   0x5   :  { %p75_p0 = scmp.ne.s32.totalorder %s52_s11, %s74_s0  ;;  %p80_p2 = scmp.lt.s32.totalorder %s74_s0, %s74_s0 }
   0x6   :  { %19 = vperm.xlu0 %73, %v10_v2   ;;  %v13_v5 = vadd.s32 128, %v12_v4  ;;  %v14_v6 = vadd.s32 256, %v12_v4 }
   0x7   :  { %p81_p3 = por %p80_p2, %p79_p1 }
   0x9   :  { %p82_p4 = pnand %p81_p3, %p75_p0 }
  0x7d   :  { %v17_v7 = vpop.permute.xlu0 %16 }
  0x7e   :  { %vm21_vm1 = vcmp.eq.s32.totalorder %v12_v4, %v17_v7  ;;  %vm22_vm2 = vcmp.eq.s32.totalorder %v13_v5, %v17_v7  ;;  %vm23_vm3 = vcmp.eq.s32.totalorder %v14_v6, %v17_v7 }
  0x7f   :  { %v62_v9 = vsel %vm21_vm1, 1.0, %v98_v8  ;;  %v63_v10 = vsel %vm22_vm2, 1.0, %v98_v8  ;;  %v64_v11 = vsel %vm23_vm3, 1.0, %v98_v8 }
  0x80   :  { %39 = vst [vmem:[#allocation2] sm:$0xff] %v62_v9  ;;  %40 = vst [vmem:[#allocation2 + $0x8] sm:$0xff] %v63_v10 }
  0x81   :  { %42 = vst.msk [vmem:[#allocation2 + $0x10] sm:$0xff] %vm41_vm0, %v64_v11  ;;  %v20_v12 = vpop.permute.xlu0 %19 }
  0x82   :  { %vm24_vm4 = vcmp.eq.s32.totalorder %v12_v4, %v20_v12  ;;  %vm25_vm5 = vcmp.eq.s32.totalorder %v13_v5, %v20_v12  ;;  %vm26_vm6 = vcmp.eq.s32.totalorder %v14_v6, %v20_v12 }
  0x83   :  { %v65_v13 = vsel %vm24_vm4, 1.0, %v98_v8  ;;  %v66_v14 = vsel %vm25_vm5, 1.0, %v98_v8  ;;  %v67_v15 = vsel %vm26_vm6, 1.0, %v98_v8 }
  0x84   :  { %43 = vst [vmem:[#allocation2 + $0x18] sm:$0xff] %v65_v13  ;;  %44 = vst [vmem:[#allocation2 + $0x20] sm:$0xff] %v66_v14 }
  0x85   :  { %45 = vst.msk [vmem:[#allocation2 + $0x28] sm:$0xff] %vm41_vm0, %v67_v15 }
  0x86   :  { %85 = shalt.err (!%p82_p4)
}
  0x87   :  { %s99_s12 = smov 384   ;;  %s100_s13 = smov 24  }
  0x88   :  { %57 = dma.vmem_to_hbm [thread:$0]  %s52_s11, 768, %s123_s1, [#allocation3], %s99_s12, %s99_s12, %s100_s13  }
  0x89   :  { %94 = dma.done.wait [#allocation3], 768  }
  0x8a   :  { %95 = vsyncadd [#allocation3], 4294966528 }
  0x8b   :  { %61 = vsyncpa [#allocation3], 1 }

</bundles_post_ra>
